<compile_context>
chip_gen: v6e
topology: v6e:2x2x1
jax: 0.10.0
libtpu: 0.0.40
codegen_flags: <defaults>
</compile_context>

<pallas_src>
import math
import functools

import jax
import jax.numpy as jnp
from jax import lax
from jax.experimental import pallas as pl
from jax.experimental.pallas import tpu as pltpu


def _round_up(x: int, m: int) -> int:
    return ((x + m - 1) // m) * m


def create_positional_encoding(max_len: int, d_model: int) -> jnp.ndarray:
    """Reproduces the (non-standard) PyTorch loop exactly, vectorized."""
    pos = jnp.arange(max_len, dtype=jnp.float32)[:, None]           # (max_len, 1)
    i_even = jnp.arange(0, d_model, 2, dtype=jnp.float32)[None, :]  # (1, d_model//2)
    pe = jnp.zeros((max_len, d_model), dtype=jnp.float32)
    # pe[pos, i]   = sin(pos / 10000 ** (2 * i / d_model))
    pe = pe.at[:, 0::2].set(jnp.sin(pos / 10000.0 ** (2.0 * i_even / d_model)))
    # pe[pos, i+1] = cos(pos / 10000 ** (2 * (i + 1) / d_model))
    pe = pe.at[:, 1::2].set(jnp.cos(pos / 10000.0 ** (2.0 * (i_even + 1.0) / d_model)))
    return pe  # (max_len, d_model)


def _embed_kernel(ids_ref, emb_ref, pe_ref, out_ref, *, scale, tl, l_pad):
    """One (TL, D) output tile per grid step.

    ids_ref : (B*L_pad,) int32 in SMEM (scalar prefetch)
    emb_ref : (V, D) VMEM-resident embedding table (constant index_map)
    pe_ref  : (TL, D) positional-encoding tile for this sequence block
    out_ref : (TL, D) output tile (batch dim squeezed by BlockSpec)
    """
    b = pl.program_id(0)
    lb = pl.program_id(1)
    base = b * l_pad + lb * tl

    def body(i, carry):
        tok = ids_ref[base + i]                     # scalar read from SMEM
        row = emb_ref[pl.ds(tok, 1), :]             # (1, D) gather from VMEM table
        out_ref[pl.ds(i, 1), :] = row * scale + pe_ref[pl.ds(i, 1), :]
        return carry

    lax.fori_loop(0, tl, body, 0, unroll=min(tl, 8))


def embeddings_forward(encoded_words: jnp.ndarray,
                       embed_table: jnp.ndarray,
                       pe: jnp.ndarray) -> jnp.ndarray:
    """
    encoded_words: (B, L) int32 token ids
    embed_table:   (vocab_size, D) float32
    pe:            (max_len, D) float32
    returns:       (B, L, D) float32
    """
    B, L = encoded_words.shape
    V, D = embed_table.shape
    scale = math.sqrt(D)

    # Token-block size: multiple of 8 (sublane) up to 256 tokens per step.
    TL = 256 if L >= 256 else _round_up(L, 8)
    L_pad = _round_up(L, TL)
    num_lb = L_pad // TL

    # Pad ids (padded ids = 0, a valid row; padded output rows sliced away).
    ids = encoded_words.astype(jnp.int32)
    ids = jnp.pad(ids, ((0, 0), (0, L_pad - L)))
    ids_flat = ids.reshape(B * L_pad)

    # PE slice for this sequence length, padded to the block multiple.
    pe_sl = pe[:L].astype(jnp.float32)
    pe_pad = jnp.pad(pe_sl, ((0, L_pad - L), (0, 0)))

    # VMEM budget: resident table (+double-buffer slack) + PE/out tiles (x2).
    vmem_needed = (2 * V * D + 4 * TL * D) * 4 + (2 << 20)
    vmem_limit = int(min(max(vmem_needed, 32 * 1024 * 1024), 96 * 1024 * 1024))
    # TODO(synk): for vocab tables too large for VMEM (esp. v7x's 64 MiB),
    # fall back to memory_space=pl.ANY + manual double-buffered DMA row gather.

    grid_spec = pltpu.PrefetchScalarGridSpec(
        num_scalar_prefetch=1,              # ids_flat -> SMEM, feeds kernel + index_maps
        grid=(B, num_lb),
        in_specs=[
            # embedding table: constant block index => DMA'd into VMEM once
            pl.BlockSpec((V, D), lambda b, l, ids: (0, 0)),
            # positional encoding: (TL, D) tile per sequence block
            pl.BlockSpec((TL, D), lambda b, l, ids: (l, 0)),
        ],
        # batch dim squeezed; kernel sees a dense (TL, D) output tile
        out_specs=pl.BlockSpec((None, TL, D), lambda b, l, ids: (b, l, 0)),
    )

    out_pad = pl.pallas_call(
        functools.partial(_embed_kernel, scale=scale, tl=TL, l_pad=L_pad),
        out_shape=jax.ShapeDtypeStruct((B, L_pad, D), jnp.float32),
        grid_spec=grid_spec,
        compiler_params=pltpu.CompilerParams(
            dimension_semantics=("parallel", "parallel"),
            vmem_limit_bytes=vmem_limit,
        ),
    )(ids_flat, embed_table.astype(jnp.float32), pe_pad)

    # TODO(synk): nn.Dropout(0.1) is stochastic in train mode; eval-mode
    # (identity) semantics are implemented here.
    return out_pad[:, :L, :]


if __name__ == "__main__":
    # Small, module-consistent shapes.
    vocab_size, d_model, max_len = 64, 32, 50
    B, L = 2, 8

    key = jax.random.PRNGKey(0)
    k_emb, k_ids = jax.random.split(key)

    # nn.Embedding default init: N(0, 1)
    embed_table = jax.random.normal(k_emb, (vocab_size, d_model), dtype=jnp.float32)
    pe = create_positional_encoding(max_len, d_model)
    encoded_words = jax.random.randint(k_ids, (B, L), 0, vocab_size, dtype=jnp.int32)

    out = embeddings_forward(encoded_words, embed_table, pe)
    out = jax.block_until_ready(out)

    # Reference check in plain JAX.
    ref = embed_table[encoded_words] * math.sqrt(d_model) + pe[None, :L]
    assert out.shape == (B, L, d_model)
    assert jnp.allclose(out, ref, atol=1e-5), "mismatch vs reference"

    print("KERNEL_OK")
</pallas_src>

<mosaic_0001>
module attributes {stable_mosaic.version = 11 : i64} {
  func.func @_embed_kernel(%arg0: i32, %arg1: i32, %arg2: memref<16xi32, #tpu.memory_space<smem>>, %arg3: memref<64x32xf32, #tpu.memory_space<vmem>>, %arg4: memref<8x32xf32, #tpu.memory_space<vmem>>, %arg5: memref<1x8x32xf32, #tpu.memory_space<vmem>>) attributes {dimension_semantics = [#tpu.dimension_semantics<parallel>, #tpu.dimension_semantics<parallel>], iteration_bounds = array<i64: 2, 1>, scalar_prefetch = 1 : i64, scratch_operands = 0 : i64, tpu.core_type = #tpu.core_type<tc>, window_params = [{pipeline_mode = #tpu.pipeline_mode<synchronous>, transform_indices = @transform_0, window_bounds = array<i64: 64, 32>}, {transform_indices = @transform_1, window_bounds = array<i64: 8, 32>}, {transform_indices = @transform_2, window_bounds = array<i64: 1, 8, 32>}]} {
    %c8_i32 = arith.constant 8 : i32
    %0 = arith.muli %arg0, %c8_i32 : i32
    %c8_i32_0 = arith.constant 8 : i32
    %1 = arith.muli %arg1, %c8_i32_0 : i32
    %2 = arith.addi %0, %1 : i32
    %c0_i32 = arith.constant 0 : i32
    %3 = arith.addi %2, %c0_i32 : i32
    %4 = arith.index_cast %3 : i32 to index
    %5 = memref.load %arg2[%4] : memref<16xi32, #tpu.memory_space<smem>>
    %6 = arith.index_cast %5 : i32 to index
    %c0 = arith.constant 0 : index
    %7 = vector.load %arg3[%6, %c0] : memref<64x32xf32, #tpu.memory_space<vmem>>, vector<1x32xf32>
    %cst = arith.constant 5.65685415 : f32
    %8 = vector.broadcast %cst : f32 to vector<1x32xf32>
    %9 = arith.mulf %7, %8 : vector<1x32xf32>
    %10 = arith.index_cast %c0_i32 : i32 to index
    %c0_1 = arith.constant 0 : index
    %11 = vector.load %arg4[%10, %c0_1] : memref<8x32xf32, #tpu.memory_space<vmem>>, vector<1x32xf32>
    %12 = arith.addf %9, %11 : vector<1x32xf32>
    %c0_2 = arith.constant 0 : index
    %13 = arith.index_cast %c0_i32 : i32 to index
    %c0_3 = arith.constant 0 : index
    %14 = vector.load %arg5[%c0_2, %13, %c0_3] : memref<1x8x32xf32, #tpu.memory_space<vmem>>, vector<1x1x32xf32>
    %15 = vector.shape_cast %14 : vector<1x1x32xf32> to vector<1x32xf32>
    %16 = vector.shape_cast %12 : vector<1x32xf32> to vector<1x1x32xf32>
    tpu.vector_store %arg5[%c0_2, %13, %c0_3], %16 {strides = array<i32>} : memref<1x8x32xf32, #tpu.memory_space<vmem>>, vector<1x1x32xf32>,
    %c1_i32 = arith.constant 1 : i32
    %17 = arith.addi %2, %c1_i32 : i32
    %18 = arith.index_cast %17 : i32 to index
    %19 = memref.load %arg2[%18] : memref<16xi32, #tpu.memory_space<smem>>
    %20 = arith.index_cast %19 : i32 to index
    %c0_4 = arith.constant 0 : index
    %21 = vector.load %arg3[%20, %c0_4] : memref<64x32xf32, #tpu.memory_space<vmem>>, vector<1x32xf32>
    %cst_5 = arith.constant 5.65685415 : f32
    %22 = vector.broadcast %cst_5 : f32 to vector<1x32xf32>
    %23 = arith.mulf %21, %22 : vector<1x32xf32>
    %24 = arith.index_cast %c1_i32 : i32 to index
    %c0_6 = arith.constant 0 : index
    %25 = vector.load %arg4[%24, %c0_6] : memref<8x32xf32, #tpu.memory_space<vmem>>, vector<1x32xf32>
    %26 = arith.addf %23, %25 : vector<1x32xf32>
    %c0_7 = arith.constant 0 : index
    %27 = arith.index_cast %c1_i32 : i32 to index
    %c0_8 = arith.constant 0 : index
    %28 = vector.load %arg5[%c0_7, %27, %c0_8] : memref<1x8x32xf32, #tpu.memory_space<vmem>>, vector<1x1x32xf32>
    %29 = vector.shape_cast %28 : vector<1x1x32xf32> to vector<1x32xf32>
    %30 = vector.shape_cast %26 : vector<1x32xf32> to vector<1x1x32xf32>
    tpu.vector_store %arg5[%c0_7, %27, %c0_8], %30 {strides = array<i32>} : memref<1x8x32xf32, #tpu.memory_space<vmem>>, vector<1x1x32xf32>,
    %c2_i32 = arith.constant 2 : i32
    %31 = arith.addi %2, %c2_i32 : i32
    %32 = arith.index_cast %31 : i32 to index
    %33 = memref.load %arg2[%32] : memref<16xi32, #tpu.memory_space<smem>>
    %34 = arith.index_cast %33 : i32 to index
    %c0_9 = arith.constant 0 : index
    %35 = vector.load %arg3[%34, %c0_9] : memref<64x32xf32, #tpu.memory_space<vmem>>, vector<1x32xf32>
    %cst_10 = arith.constant 5.65685415 : f32
    %36 = vector.broadcast %cst_10 : f32 to vector<1x32xf32>
    %37 = arith.mulf %35, %36 : vector<1x32xf32>
    %38 = arith.index_cast %c2_i32 : i32 to index
    %c0_11 = arith.constant 0 : index
    %39 = vector.load %arg4[%38, %c0_11] : memref<8x32xf32, #tpu.memory_space<vmem>>, vector<1x32xf32>
    %40 = arith.addf %37, %39 : vector<1x32xf32>
    %c0_12 = arith.constant 0 : index
    %41 = arith.index_cast %c2_i32 : i32 to index
    %c0_13 = arith.constant 0 : index
    %42 = vector.load %arg5[%c0_12, %41, %c0_13] : memref<1x8x32xf32, #tpu.memory_space<vmem>>, vector<1x1x32xf32>
    %43 = vector.shape_cast %42 : vector<1x1x32xf32> to vector<1x32xf32>
    %44 = vector.shape_cast %40 : vector<1x32xf32> to vector<1x1x32xf32>
    tpu.vector_store %arg5[%c0_12, %41, %c0_13], %44 {strides = array<i32>} : memref<1x8x32xf32, #tpu.memory_space<vmem>>, vector<1x1x32xf32>,
    %c3_i32 = arith.constant 3 : i32
    %45 = arith.addi %2, %c3_i32 : i32
    %46 = arith.index_cast %45 : i32 to index
    %47 = memref.load %arg2[%46] : memref<16xi32, #tpu.memory_space<smem>>
    %48 = arith.index_cast %47 : i32 to index
    %c0_14 = arith.constant 0 : index
    %49 = vector.load %arg3[%48, %c0_14] : memref<64x32xf32, #tpu.memory_space<vmem>>, vector<1x32xf32>
    %cst_15 = arith.constant 5.65685415 : f32
    %50 = vector.broadcast %cst_15 : f32 to vector<1x32xf32>
    %51 = arith.mulf %49, %50 : vector<1x32xf32>
    %52 = arith.index_cast %c3_i32 : i32 to index
    %c0_16 = arith.constant 0 : index
    %53 = vector.load %arg4[%52, %c0_16] : memref<8x32xf32, #tpu.memory_space<vmem>>, vector<1x32xf32>
    %54 = arith.addf %51, %53 : vector<1x32xf32>
    %c0_17 = arith.constant 0 : index
    %55 = arith.index_cast %c3_i32 : i32 to index
    %c0_18 = arith.constant 0 : index
    %56 = vector.load %arg5[%c0_17, %55, %c0_18] : memref<1x8x32xf32, #tpu.memory_space<vmem>>, vector<1x1x32xf32>
    %57 = vector.shape_cast %56 : vector<1x1x32xf32> to vector<1x32xf32>
    %58 = vector.shape_cast %54 : vector<1x32xf32> to vector<1x1x32xf32>
    tpu.vector_store %arg5[%c0_17, %55, %c0_18], %58 {strides = array<i32>} : memref<1x8x32xf32, #tpu.memory_space<vmem>>, vector<1x1x32xf32>,
    %c4_i32 = arith.constant 4 : i32
    %59 = arith.addi %2, %c4_i32 : i32
    %60 = arith.index_cast %59 : i32 to index
    %61 = memref.load %arg2[%60] : memref<16xi32, #tpu.memory_space<smem>>
    %62 = arith.index_cast %61 : i32 to index
    %c0_19 = arith.constant 0 : index
    %63 = vector.load %arg3[%62, %c0_19] : memref<64x32xf32, #tpu.memory_space<vmem>>, vector<1x32xf32>
    %cst_20 = arith.constant 5.65685415 : f32
    %64 = vector.broadcast %cst_20 : f32 to vector<1x32xf32>
    %65 = arith.mulf %63, %64 : vector<1x32xf32>
    %66 = arith.index_cast %c4_i32 : i32 to index
    %c0_21 = arith.constant 0 : index
    %67 = vector.load %arg4[%66, %c0_21] : memref<8x32xf32, #tpu.memory_space<vmem>>, vector<1x32xf32>
    %68 = arith.addf %65, %67 : vector<1x32xf32>
    %c0_22 = arith.constant 0 : index
    %69 = arith.index_cast %c4_i32 : i32 to index
    %c0_23 = arith.constant 0 : index
    %70 = vector.load %arg5[%c0_22, %69, %c0_23] : memref<1x8x32xf32, #tpu.memory_space<vmem>>, vector<1x1x32xf32>
    %71 = vector.shape_cast %70 : vector<1x1x32xf32> to vector<1x32xf32>
    %72 = vector.shape_cast %68 : vector<1x32xf32> to vector<1x1x32xf32>
    tpu.vector_store %arg5[%c0_22, %69, %c0_23], %72 {strides = array<i32>} : memref<1x8x32xf32, #tpu.memory_space<vmem>>, vector<1x1x32xf32>,
    %c5_i32 = arith.constant 5 : i32
    %73 = arith.addi %2, %c5_i32 : i32
    %74 = arith.index_cast %73 : i32 to index
    %75 = memref.load %arg2[%74] : memref<16xi32, #tpu.memory_space<smem>>
    %76 = arith.index_cast %75 : i32 to index
    %c0_24 = arith.constant 0 : index
    %77 = vector.load %arg3[%76, %c0_24] : memref<64x32xf32, #tpu.memory_space<vmem>>, vector<1x32xf32>
    %cst_25 = arith.constant 5.65685415 : f32
    %78 = vector.broadcast %cst_25 : f32 to vector<1x32xf32>
    %79 = arith.mulf %77, %78 : vector<1x32xf32>
    %80 = arith.index_cast %c5_i32 : i32 to index
    %c0_26 = arith.constant 0 : index
    %81 = vector.load %arg4[%80, %c0_26] : memref<8x32xf32, #tpu.memory_space<vmem>>, vector<1x32xf32>
    %82 = arith.addf %79, %81 : vector<1x32xf32>
    %c0_27 = arith.constant 0 : index
    %83 = arith.index_cast %c5_i32 : i32 to index
    %c0_28 = arith.constant 0 : index
    %84 = vector.load %arg5[%c0_27, %83, %c0_28] : memref<1x8x32xf32, #tpu.memory_space<vmem>>, vector<1x1x32xf32>
    %85 = vector.shape_cast %84 : vector<1x1x32xf32> to vector<1x32xf32>
    %86 = vector.shape_cast %82 : vector<1x32xf32> to vector<1x1x32xf32>
    tpu.vector_store %arg5[%c0_27, %83, %c0_28], %86 {strides = array<i32>} : memref<1x8x32xf32, #tpu.memory_space<vmem>>, vector<1x1x32xf32>,
    %c6_i32 = arith.constant 6 : i32
    %87 = arith.addi %2, %c6_i32 : i32
    %88 = arith.index_cast %87 : i32 to index
    %89 = memref.load %arg2[%88] : memref<16xi32, #tpu.memory_space<smem>>
    %90 = arith.index_cast %89 : i32 to index
    %c0_29 = arith.constant 0 : index
    %91 = vector.load %arg3[%90, %c0_29] : memref<64x32xf32, #tpu.memory_space<vmem>>, vector<1x32xf32>
    %cst_30 = arith.constant 5.65685415 : f32
    %92 = vector.broadcast %cst_30 : f32 to vector<1x32xf32>
    %93 = arith.mulf %91, %92 : vector<1x32xf32>
    %94 = arith.index_cast %c6_i32 : i32 to index
    %c0_31 = arith.constant 0 : index
    %95 = vector.load %arg4[%94, %c0_31] : memref<8x32xf32, #tpu.memory_space<vmem>>, vector<1x32xf32>
    %96 = arith.addf %93, %95 : vector<1x32xf32>
    %c0_32 = arith.constant 0 : index
    %97 = arith.index_cast %c6_i32 : i32 to index
    %c0_33 = arith.constant 0 : index
    %98 = vector.load %arg5[%c0_32, %97, %c0_33] : memref<1x8x32xf32, #tpu.memory_space<vmem>>, vector<1x1x32xf32>
    %99 = vector.shape_cast %98 : vector<1x1x32xf32> to vector<1x32xf32>
    %100 = vector.shape_cast %96 : vector<1x32xf32> to vector<1x1x32xf32>
    tpu.vector_store %arg5[%c0_32, %97, %c0_33], %100 {strides = array<i32>} : memref<1x8x32xf32, #tpu.memory_space<vmem>>, vector<1x1x32xf32>,
    %c7_i32 = arith.constant 7 : i32
    %101 = arith.addi %2, %c7_i32 : i32
    %102 = arith.index_cast %101 : i32 to index
    %103 = memref.load %arg2[%102] : memref<16xi32, #tpu.memory_space<smem>>
    %104 = arith.index_cast %103 : i32 to index
    %c0_34 = arith.constant 0 : index
    %105 = vector.load %arg3[%104, %c0_34] : memref<64x32xf32, #tpu.memory_space<vmem>>, vector<1x32xf32>
    %cst_35 = arith.constant 5.65685415 : f32
    %106 = vector.broadcast %cst_35 : f32 to vector<1x32xf32>
    %107 = arith.mulf %105, %106 : vector<1x32xf32>
    %108 = arith.index_cast %c7_i32 : i32 to index
    %c0_36 = arith.constant 0 : index
    %109 = vector.load %arg4[%108, %c0_36] : memref<8x32xf32, #tpu.memory_space<vmem>>, vector<1x32xf32>
    %110 = arith.addf %107, %109 : vector<1x32xf32>
    %c0_37 = arith.constant 0 : index
    %111 = arith.index_cast %c7_i32 : i32 to index
    %c0_38 = arith.constant 0 : index
    %112 = vector.load %arg5[%c0_37, %111, %c0_38] : memref<1x8x32xf32, #tpu.memory_space<vmem>>, vector<1x1x32xf32>
    %113 = vector.shape_cast %112 : vector<1x1x32xf32> to vector<1x32xf32>
    %114 = vector.shape_cast %110 : vector<1x32xf32> to vector<1x1x32xf32>
    tpu.vector_store %arg5[%c0_37, %111, %c0_38], %114 {strides = array<i32>} : memref<1x8x32xf32, #tpu.memory_space<vmem>>, vector<1x1x32xf32>,
    %c8_i32_39 = arith.constant 8 : i32
    return
  }
  func.func @transform_0(%arg0: i32, %arg1: i32, %arg2: memref<16xi32, #tpu.memory_space<smem>>) -> (i32, i32) {
    %c0_i32 = arith.constant 0 : i32
    %c0_i32_0 = arith.constant 0 : i32
    %c0_i32_1 = arith.constant 0 : i32
    return %c0_i32, %c0_i32_0 : i32, i32
  }
  func.func @transform_1(%arg0: i32, %arg1: i32, %arg2: memref<16xi32, #tpu.memory_space<smem>>) -> (i32, i32) {
    %c0_i32 = arith.constant 0 : i32
    %c0_i32_0 = arith.constant 0 : i32
    return %arg1, %c0_i32 : i32, i32
  }
  func.func @transform_2(%arg0: i32, %arg1: i32, %arg2: memref<16xi32, #tpu.memory_space<smem>>) -> (i32, i32, i32) {
    %c0_i32 = arith.constant 0 : i32
    %c0_i32_0 = arith.constant 0 : i32
    return %arg0, %arg1, %c0_i32 : i32, i32, i32
  }
}

</mosaic_0001>

<bundles_post_ra>
// kernel: tpu_custom_call.1
= control target key start
LH: loop header
LB: loop body
LE: loop exit
PB: predicated region body
PF: predicated region fallthrough
CT: control target
= control target key end

     0   :  { %s689_s0 = inlined_call_operand.vmem [shape: s32[16], index: 0, kind: input, shape index: {}]   ;;  %s690_s1 = inlined_call_operand.vmem [shape: f32[64,32], index: 1, kind: input, shape index: {}]   ;;  %s691_s2 = inlined_call_operand.vmem [shape: f32[8,32], index: 2, kind: input, shape index: {}]   ;;  %s692_s3 = inlined_call_operand.hbm [shape: f32[2,8,32], index: 3, kind: output, shape index: {}]  }
   0x1   :  { %s8_s14 = sshll.u32 %s689_s0, 4  ;;  %s9_s14 = int_to_ptr.vmem [resolvable:$true] %s8_s14 }
   0x2   :  { %s388_s15 = scalar_lea.vmem %s9_s14, 16  ;;  %p393_p1 = scmp.lt.s32.totalorder %s9_s14, %s9_s14 }
   0x3   :  { %p389_p0 = scmp.ne.s32.totalorder %s9_s14, %s388_s15  ;;  %p394_p2 = scmp.lt.s32.totalorder %s388_s15, %s388_s15 }
   0x5   :  { %p395_p3 = por %p394_p2, %p393_p1 }
   0x7   :  { %p396_p4 = pnand %p395_p3, %p389_p0 }
   0x9   :  { %399 = shalt.err (!%p396_p4)  }
   0xa   :  { %s480_s16 = smov [#allocation3]  }
   0xb   :  { %11 = dma.vmem_to_smem %s9_s14, 16, %s480_s16, [#allocation2] }
   0xc   :  { %450 = dma.done.wait [#allocation2], 16 }
   0xd   :  { %451 = vsyncadd [#allocation2], 4294967280 }
   0xe   :  { %13 = sfence }
   0xf   :  { %14 = vsyncpa [#allocation5], 0 }
  0x10   :  { %16 = vsyncpa [#allocation5 + $0x1], 0  ;;  %s505_s17 = smov 0   ;;  %s507_s18 = smov 0  }
  0x11   :  { %s509_s0 = smov 0   ;;  %s511_s19 = smov 0  }
  0x12   :  { %s513_s20 = smov 0   ;;  %s515_s21 = smov 0  }
  0x13 LB: > { %696 = sst [smem:[#allocation8_spill]] %s474_s20  ;;  %s321_s22 = sadd.s32 4294967295, %s478_s21   ;;  %s478_s21 = sphi %s515_s21, %s22_s21   ;;  %s474_s20 = sphi %s513_s20, %s702_s20   ;;  %s470_s19 = sphi %s511_s19, %s701_s19   ;;  %s466_s0 = sphi %s509_s0, %s705_s0   ;;  %s462_s18 = sphi %s507_s18, %s704_s18   ;;  %s458_s17 = sphi %s505_s17, %s703_s17  }
  0x14   : > { %s322_s23 = sadd.s32 4294967294, %s478_s21   ;;  %s34_s24 = sadd.s32 1, %s474_s20 }
  0x15   : > { %s90_s25 = sadd.s32 1, %s466_s0  ;;  %p36_p5 = scmp.ge.s32.totalorder %s34_s24, 2 }
  0x16   : > { %p100_p6 = scmp.ne.s32.totalorder %s466_s0, %s462_s18  ;;  %p101_p7 = scmp.eq.s32.totalorder %s321_s22, 1 }
  0x17   : > { %p106_p8 = scmp.ne.s32.totalorder %s462_s18, %s458_s17  ;;  %s707_s24 = smov (%p36_p5, %s34_s24), 0 }
  0x18   : > { %697 = sst [smem:[#allocation9_spill]] %s707_s24  ;;  %p545_p9 = por %p101_p7, %p100_p6 }
  0x19   : > { %p107_p10 = scmp.eq.s32.totalorder %s322_s23, 1  ;;  %s85_s27 = ssub.s32 %s474_s20, %s707_s24 }
  0x1a   : > { %p325_p11 = scmp.ge.s32.totalorder %s478_s21, 1  ;;  %p88_p12 = scmp.eq.s32.totalorder %s85_s27, 0 }
  0x1b   : > { %p552_p13 = por %p107_p10, %p106_p8  ;;  %p135_p0 = scmp.lt.s32.totalorder %s478_s21, 3 }
  0x1c   : > { %s558_s29 = scalar_select %p88_p12, %s466_s0, %s90_s25  }
  0x1d   : > { %p136_p1 = pnand %p325_p11, %p135_p0 }
  0x1e   : > { %s693_s30 = sand.u32 (!%p136_p1), 1, %s462_s18   ;;  %s327_s4 = sshll.u32 (!%p136_p1), %s470_s19, 3 }
  0x1f   : > { %139 = sbr.rel (%p136_p1) target bundleno = 71 (0x47), region = 28  ;;  %s564_s5 = sshll.u32 (!%p136_p1), %s693_s30, 3 }
  0x20   : > { %s163_s6 = sld [smem:[#allocation3 + %s327_s4]] (!%p136_p1)  ;;  %s171_s7 = sadd.s32 (!%p136_p1), 1, %s327_s4 }
  0x21   : > { %s179_s8 = sadd.s32 (!%p136_p1), 2, %s327_s4  ;;  %s172_s9 = sld [smem:[#allocation3 + %s171_s7]] (!%p136_p1) }
  0x22   : > { %s187_s10 = sadd.s32 (!%p136_p1), 3, %s327_s4  ;;  %s180_s11 = sld [smem:[#allocation3 + %s179_s8]] (!%p136_p1) }
  0x23   : > { %s195_s12 = sadd.s32 (!%p136_p1), 4, %s327_s4  ;;  %s188_s13 = sld [smem:[#allocation3 + %s187_s10]] (!%p136_p1) }
  0x24   : > { %s203_s14 = sadd.s32 5, %s327_s4  ;;  %s196_s23 = sld [smem:[#allocation3 + %s195_s12]]  ;;  %v167_v1 = vld [vmem:[%s691_s2] sm:$0x1]  ;;  %vm169_vm0 = vcmask 253952  }
  0x25   : > { %s572_s30 = sld [smem:[#allocation3 + %s203_s14]]  ;;  %s211_s24 = sadd.s32 6, %s327_s4  ;;  %v176_v5 = vld [vmem:[%s691_s2 + $0x1] sm:$0x1]  ;;  %v184_v6 = vld [vmem:[%s691_s2 + $0x2] sm:$0x1] }
  0x26   : > { %s164_s22 = scalar_lea.vmem %s690_s1, %s163_s6  ;;  %s574_s7 = sld [smem:[#allocation3 + %s211_s24]]  ;;  %v192_v9 = vld [vmem:[%s691_s2 + $0x3] sm:$0x1]  ;;  %v200_v12 = vld [vmem:[%s691_s2 + $0x4] sm:$0x1] }
  0x27   : > { %v165_v0 = vld [vmem:[%s164_s22] sm:$0x1]  ;;  %s219_s8 = sadd.s32 7, %s327_s4  ;;  %s173_s15 = scalar_lea.vmem %s690_s1, %s172_s9  ;;  %v208_v16 = vld [vmem:[%s691_s2 + $0x5] sm:$0x1] }
  0x28   : > { %v166_v2 = vmul.f32 5.656854, %v165_v0  ;;  %s579_s6 = sld [smem:[#allocation3 + %s219_s8]]  ;;  %v174_v4 = vld [vmem:[%s173_s15] sm:$0x1]  ;;  %s181_s24 = scalar_lea.vmem %s690_s1, %s180_s11 }
  0x29   : > { %v175_v7 = vmul.f32 5.656854, %v174_v4  ;;  %v182_v8 = vld [vmem:[%s181_s24] sm:$0x1]  ;;  %s189_s27 = scalar_lea.vmem %s690_s1, %s188_s13  ;;  %s597_s15 = scalar_lea.vmem [#allocation4], %s564_s5 }
  0x2a   : > { %v168_v3 = vadd.f32 %v167_v1, %v166_v2  ;;  %v183_v10 = vmul.f32 5.656854, %v182_v8  ;;  %v190_v11 = vld [vmem:[%s189_s27] sm:$0x1]  ;;  %s197_s16 = scalar_lea.vmem %s690_s1, %s196_s23  ;;  %v216_v20 = vld [vmem:[%s691_s2 + $0x6] sm:$0x1] }
  0x2b   : > { %v177_v13 = vadd.f32 %v176_v5, %v175_v7  ;;  %v191_v14 = vmul.f32 5.656854, %v190_v11  ;;  %v198_v15 = vld [vmem:[%s197_s16] sm:$0x1]  ;;  %s205_s24 = scalar_lea.vmem %s690_s1, %s572_s30  ;;  %v224_v24 = vld [vmem:[%s691_s2 + $0x7] sm:$0x1] }
  0x2c   : > { %170 = vst.msk [vmem:[%s597_s15] sm:$0x1] %vm169_vm0, %v168_v3  ;;  %v185_v17 = vadd.f32 %v184_v6, %v183_v10  ;;  %v199_v18 = vmul.f32 5.656854, %v198_v15  ;;  %v206_v19 = vld [vmem:[%s205_s24] sm:$0x1]  ;;  %s213_s9 = scalar_lea.vmem %s690_s1, %s574_s7 }
  0x2d   : > { %178 = vst.msk [vmem:[%s597_s15 + $0x1] sm:$0x1] %vm169_vm0, %v177_v13  ;;  %v193_v21 = vadd.f32 %v192_v9, %v191_v14  ;;  %v207_v22 = vmul.f32 5.656854, %v206_v19  ;;  %v214_v23 = vld [vmem:[%s213_s9] sm:$0x1] }
  0x2e   : > { %s221_s11 = scalar_lea.vmem %s690_s1, %s579_s6  ;;  %186 = vst.msk [vmem:[%s597_s15 + $0x2] sm:$0x1] %vm169_vm0, %v185_v17  ;;  %v201_v25 = vadd.f32 %v200_v12, %v199_v18  ;;  %v215_v26 = vmul.f32 5.656854, %v214_v23  ;;  %s329_s7 = sshll.u32 %s470_s19, 7 }
  0x2f   : > { %v222_v27 = vld [vmem:[%s221_s11] sm:$0x1]  ;;  %s242_s14 = sshll.u32 %s597_s15, 4  ;;  %194 = vst.msk [vmem:[%s597_s15 + $0x3] sm:$0x1] %vm169_vm0, %v193_v21  ;;  %v209_v28 = vadd.f32 %v208_v16, %v207_v22  ;;  %s643_s5 = scalar_lea.hbm %s692_s3, %s329_s7  ;;  %s243_s14 = int_to_ptr.vmem [resolvable:$true] %s242_s14 }
  0x30   : > { %v223_v29 = vmul.f32 5.656854, %v222_v27  ;;  %202 = vst.msk [vmem:[%s597_s15 + $0x4] sm:$0x1] %vm169_vm0, %v201_v25  ;;  %v217_v30 = vadd.f32 %v216_v20, %v215_v26  ;;  %s700_s19 = sand.u32 1, %s462_s18   ;;  %s400_s24 = scalar_lea.vmem %s243_s14, 128 }
  0x31   : > { %210 = vst.msk [vmem:[%s597_s15 + $0x5] sm:$0x1] %vm169_vm0, %v209_v28  ;;  %s228_s13 = scalar_lea.sflag [#allocation5], %s700_s19  ;;  %p401_p2 = scmp.ne.s32.totalorder %s243_s14, %s400_s24 }
  0x32   : > { %v225_v31 = vadd.f32 %v224_v24, %v223_v29  ;;  %218 = vst.msk [vmem:[%s597_s15 + $0x6] sm:$0x1] %vm169_vm0, %v217_v30  ;;  %s481_s25 = smov [#allocation4]  }
  0x33   : > { %p402_p3 = pnand %p401_p2, %p545_p9  ;;  %s404_s4 = sshll.u32 %s481_s25, 4  ;;  %s405_s4 = int_to_ptr.vmem [resolvable:$false] %s404_s4 }
  0x34   : > { %226 = vst.msk [vmem:[%s597_s15 + $0x7] sm:$0x1] %vm169_vm0, %v225_v31  ;;  %s406_s23 = scalar_lea.vmem %s405_s4, 256  ;;  %p407_p5 = scmp.lt.s32.totalorder %s243_s14, %s405_s4 }
  0x35   : > { %p403_p4 = pneg %p402_p3  ;;  %p408_p6 = scmp.lt.s32.totalorder %s406_s23, %s400_s24 }
  0x37   : > { %p409_p7 = por %p408_p6, %p407_p5 }
  0x39   : > { %p410_p8 = pnand %p409_p7, %p403_p4 }
  0x3b   : > { %413 = shalt.err (!%p410_p8)
}
  0x3c   : > { %s414_s15 = scalar_lea.hbm %s643_s5, 128  ;;  %s418_s27 = scalar_lea.hbm %s692_s3, 256 }
  0x3d   : > { %p415_p10 = scmp.ne.s32.totalorder %s643_s5, %s414_s15  ;;  %p419_p0 = scmp.lt.s32.totalorder %s643_s5, %s692_s3 }
  0x3e   : > { %p420_p1 = scmp.lt.s32.totalorder %s418_s27, %s414_s15 }
  0x3f   : > { %p416_p11 = pnand %p415_p10, %p545_p9 }
  0x40   : > { %p421_p2 = por %p420_p1, %p419_p0 }
  0x41   : > { %p417_p12 = pneg %p416_p11 }
  0x43   : > { %p422_p3 = pnand %p421_p2, %p417_p12 }
  0x45   : > { %425 = shalt.err (!%p422_p3)
}
  0x46   : > { %332 = dma.vmem_to_hbm [thread:$0]  (%p545_p9), %s243_s14, 128, %s643_s5, %s228_s13  }
  0x47 PF: > { %p338_p4 = scmp.ge.s32.totalorder %s478_s21, 2  ;;  %s254_s10 = sand.u32 1, %s458_s17  }
  0x48   : > { %s255_s11 = scalar_lea.sflag [#allocation5], %s254_s10 }
  0x49   : > { %p335_p5 = pnand %p338_p4, %p552_p13 }
  0x4b   : > { %p336_p6 = pneg %p335_p5 }
  0x4d   : > { %453 = dma.done.wait (%p336_p6), %s255_s11, 128  }
  0x4e   : > { %455 = vsyncadd (%p336_p6), %s255_s11, 4294967168  ;;  %s22_s21 = sadd.s32 1, %s478_s21   ;;  %s701_s19 = sld [smem:[#allocation8_spill]] }
  0x4f   : > { %p19_p7 = scmp.ge.s32.totalorder %s22_s21, 4   ;;  %s702_s20 = sld [smem:[#allocation9_spill]] }
  0x50   : > { %s703_s17 = smov %s462_s18  ;;  %s704_s18 = smov %s466_s0 }
  0x51   : > { %s705_s0 = smov %s558_s29  ;;  %21 = sbr.rel (!%p19_p7) target bundleno = 19 (0x13), region = 71 }
  0x56   :  { %260 = vsyncpa [#allocation5], 1 }
  0x57   :  { %262 = vsyncpa [#allocation5 + $0x1], 1 }

</bundles_post_ra>
